<compile_context>
chip_gen: v6e
topology: v6e:2x2x1
jax: 0.10.0
libtpu: 0.0.40
codegen_flags: <defaults>
</compile_context>

<pallas_src>
import jax
import jax.numpy as jnp
from jax import lax
from jax.experimental import pallas as pl
from jax.experimental.pallas import tpu as pltpu


def _net_kernel(x_ref, w1T_ref, b1_ref, w2T_ref, b2_ref, o_ref):
    """x_ref: (TB, 8) natural layout; o_ref: (4, TB) class-major, lane-dense."""
    tb = x_ref.shape[0]
    # Lane sub-chunk so the (H, chunk) intermediate stays in vregs (no spill).
    ch = tb
    for cand in (512, 256, 128):
        if tb % cand == 0:
            ch = cand
            break
    n_chunks = tb // ch

    # Weights/biases are VMEM-resident across all grid steps (index_map -> (0,0)).
    w1T = w1T_ref[...]          # (H, 8)
    b1 = b1_ref[...]            # (H, 1)
    w2T = w2T_ref[...]          # (4, H)
    b2 = b2_ref[...]            # (4, 1)

    def body(c, carry):
        start = pl.multiple_of(c * ch, ch)
        xc = x_ref[pl.ds(start, ch), :]                 # (ch, 8) natural
        xTc = xc.T                                      # (8, ch) in-kernel transpose
        # fc1: (H,8) @ (8,ch) -> (H,ch), bias broadcast over lanes, ReLU.
        h = jnp.dot(w1T, xTc, preferred_element_type=jnp.float32)
        h = jnp.maximum(h + b1, 0.0)
        # final: (4,H) @ (H,ch) -> (4,ch)
        logits = jnp.dot(w2T, h, preferred_element_type=jnp.float32) + b2
        # Numerically-stable softmax over the 4 class rows (sublane axis).
        m = jnp.max(logits, axis=0, keepdims=True)      # (1, ch)
        e = jnp.exp(logits - m)                          # (4, ch)
        denom = jnp.sum(e, axis=0, keepdims=True)        # (1, ch)
        o_ref[:, pl.ds(start, ch)] = (e / denom).astype(o_ref.dtype)
        return carry

    if n_chunks == 1:
        body(0, 0)
    else:
        lax.fori_loop(0, n_chunks, body, 0, unroll=n_chunks <= 8)


def _round_up(n, m):
    return (n + m - 1) // m * m


def net_forward_class_major(x, w1, b1, w2, b2, *, tb=32768):
    """Pallas forward of Net, no layout plumbing.

    x: (B, 8) float32 in natural layout.  Returns (4, B) class-major softmax
    probabilities (column j = probabilities for sample j).  Consumers that can
    take class-major output should use this entry point directly.
    """
    B = x.shape[0]
    H = w1.shape[1]

    # Batch tile: big enough to amortize per-grid-step overhead, capped so the
    # "parallel" grid axis has >=2 steps whenever possible (v7x megacore).
    bp0 = _round_up(B, 128)
    half = _round_up(pl.cdiv(bp0, 2), 128)
    TB = max(128, min(tb, half))
    Bp = _round_up(B, TB)
    if Bp != B:
        # Padded zero rows give finite softmax values and are sliced off below.
        x = jnp.pad(x, ((0, Bp - B), (0, 0)))

    # Weight transposes are tiny (8*H / H*4 elements) one-off layout plumbing.
    w1T = w1.T                       # (H, 8)
    w2T = w2.T                       # (4, H)
    b1c = b1.reshape(H, 1)
    b2c = b2.reshape(4, 1)

    # Explicit scoped-VMEM limit (v5e default is only 16 MiB): double-buffered
    # x + out blocks plus resident weights, with generous headroom.
    block_bytes = 2 * (TB * 8 * 4 + 4 * TB * 4) + 2 * (H * 8 + H + 4 * H + 4) * 4
    vmem_limit = int(min(64 << 20, max(2 * block_bytes + (4 << 20), 16 << 20)))

    out_cm = pl.pallas_call(
        _net_kernel,
        out_shape=jax.ShapeDtypeStruct((4, Bp), jnp.float32),
        grid=(Bp // TB,),
        in_specs=[
            pl.BlockSpec((TB, 8), lambda i: (i, 0)),   # x streams over batch (contiguous DMA)
            pl.BlockSpec((H, 8), lambda i: (0, 0)),    # weights stay VMEM-resident
            pl.BlockSpec((H, 1), lambda i: (0, 0)),
            pl.BlockSpec((4, H), lambda i: (0, 0)),
            pl.BlockSpec((4, 1), lambda i: (0, 0)),
        ],
        out_specs=pl.BlockSpec((4, TB), lambda i: (0, i)),  # lane-dense stores
        compiler_params=pltpu.CompilerParams(
            dimension_semantics=("parallel",),         # megacore on v7x
            vmem_limit_bytes=vmem_limit,
        ),
    )(x, w1T, b1c, w2T, b2c)

    return out_cm[:, :B]


def net_forward(x, w1, b1, w2, b2, *, tb=32768, min_pallas_batch=2048):
    """PyTorch-compatible forward: (B, 8) -> (B, 4), or (8,) -> (4,).

    For tiny batches (LunarLander inference) a fused XLA fast path is strictly
    cheaper than a kernel launch + padding.  For large batches the Pallas
    kernel is used; the final .T only touches the small (4, B) output
    (16 B/sample) — prefer `net_forward_class_major` to avoid even that.
    """
    squeeze = x.ndim == 1
    if squeeze:
        x = x[None, :]
    B = x.shape[0]

    if B < min_pallas_batch:
        h = jnp.maximum(x @ w1 + b1, 0.0)
        out = jax.nn.softmax(h @ w2 + b2, axis=-1)
    else:
        # TODO(synk): an interleaved (Bp//32, 128) output layout would make the
        # (B, 4) result a free bitcast-reshape instead of this small transpose.
        out = net_forward_class_major(x, w1, b1, w2, b2, tb=tb).T

    if squeeze:
        out = out[0]
    return out


def init_params(key, neurons):
    """Deterministic init mimicking PyTorch nn.Linear default U[-1/sqrt(fan_in), +]."""
    k1, k2, k3, k4 = jax.random.split(key, 4)
    bound1 = 1.0 / jnp.sqrt(8.0)
    bound2 = 1.0 / jnp.sqrt(float(neurons))
    w1 = jax.random.uniform(k1, (8, neurons), jnp.float32, -bound1, bound1)
    b1 = jax.random.uniform(k2, (neurons,), jnp.float32, -bound1, bound1)
    w2 = jax.random.uniform(k3, (neurons, 4), jnp.float32, -bound2, bound2)
    b2 = jax.random.uniform(k4, (4,), jnp.float32, -bound2, bound2)
    return w1, b1, w2, b2


if __name__ == "__main__":
    key = jax.random.PRNGKey(0)
    kx, kp, kx2 = jax.random.split(key, 3)

    NEURONS = 32
    w1, b1, w2, b2 = init_params(kp, NEURONS)

    def reference(xx):
        h = jnp.maximum(xx @ w1 + b1, 0.0)
        return jax.nn.softmax(h @ w2 + b2, axis=-1)

    # --- small batch, Pallas kernel forced (module's dim=1 softmax branch) ---
    B = 2
    x = jax.random.normal(kx, (B, 8), jnp.float32)
    out = jax.block_until_ready(net_forward(x, w1, b1, w2, b2, min_pallas_batch=0))
    ref = reference(x)
    assert out.shape == (B, 4)
    assert jnp.allclose(out, ref, atol=1e-4, rtol=1e-4), "mismatch vs reference (batched)"
    assert jnp.allclose(jnp.sum(out, axis=1), 1.0, atol=1e-5)

    # --- larger batch: multiple grid steps, in-kernel chunk loop, padding ---
    B2 = 2500
    x2 = jax.random.normal(kx2, (B2, 8), jnp.float32)
    out2 = jax.block_until_ready(
        net_forward(x2, w1, b1, w2, b2, tb=1024, min_pallas_batch=0))
    ref2 = reference(x2)
    assert out2.shape == (B2, 4)
    assert jnp.allclose(out2, ref2, atol=1e-4, rtol=1e-4), "mismatch vs reference (grid)"

    # --- class-major API: no output transpose at all ---
    out_cm = jax.block_until_ready(
        net_forward_class_major(x2, w1, b1, w2, b2, tb=1024))
    assert out_cm.shape == (4, B2)
    assert jnp.allclose(out_cm.T, ref2, atol=1e-4, rtol=1e-4), "mismatch (class-major)"

    # --- 1-D path (module's dim=0 softmax branch), Pallas kernel forced ---
    x1d = x[0]
    out1d = jax.block_until_ready(net_forward(x1d, w1, b1, w2, b2, min_pallas_batch=0))
    ref1d = jax.nn.softmax(jnp.maximum(x1d @ w1 + b1, 0.0) @ w2 + b2, axis=0)
    assert out1d.shape == (4,)
    assert jnp.allclose(out1d, ref1d, atol=1e-4, rtol=1e-4), "mismatch vs reference (1-D)"

    # --- small-batch fast path (default threshold skips the kernel) ---
    out_fast = jax.block_until_ready(net_forward(x, w1, b1, w2, b2))
    assert jnp.allclose(out_fast, ref, atol=1e-5, rtol=1e-5), "mismatch (fast path)"

    print("KERNEL_OK")
</pallas_src>

<mosaic_0001>
module attributes {stable_mosaic.version = 11 : i64} {
  func.func @_net_kernel(%arg0: i32, %arg1: memref<128x8xf32, #tpu.memory_space<vmem>>, %arg2: memref<32x8xf32, #tpu.memory_space<vmem>>, %arg3: memref<32x1xf32, #tpu.memory_space<vmem>>, %arg4: memref<4x32xf32, #tpu.memory_space<vmem>>, %arg5: memref<4x1xf32, #tpu.memory_space<vmem>>, %arg6: memref<4x128xf32, #tpu.memory_space<vmem>>) attributes {dimension_semantics = [#tpu.dimension_semantics<parallel>], iteration_bounds = array<i64: 1>, scalar_prefetch = 0 : i64, scratch_operands = 0 : i64, tpu.core_type = #tpu.core_type<tc>, window_params = [{transform_indices = @transform_0, window_bounds = array<i64: 128, 8>}, {pipeline_mode = #tpu.pipeline_mode<synchronous>, transform_indices = @transform_1, window_bounds = array<i64: 32, 8>}, {pipeline_mode = #tpu.pipeline_mode<synchronous>, transform_indices = @transform_2, window_bounds = array<i64: 32, 1>}, {pipeline_mode = #tpu.pipeline_mode<synchronous>, transform_indices = @transform_3, window_bounds = array<i64: 4, 32>}, {pipeline_mode = #tpu.pipeline_mode<synchronous>, transform_indices = @transform_4, window_bounds = array<i64: 4, 1>}, {transform_indices = @transform_5, window_bounds = array<i64: 4, 128>}]} {
    %c0 = arith.constant 0 : index
    %c0_0 = arith.constant 0 : index
    %0 = vector.load %arg2[%c0, %c0_0] : memref<32x8xf32, #tpu.memory_space<vmem>>, vector<32x8xf32>
    %c0_1 = arith.constant 0 : index
    %c0_2 = arith.constant 0 : index
    %1 = vector.load %arg3[%c0_1, %c0_2] : memref<32x1xf32, #tpu.memory_space<vmem>>, vector<32x1xf32>
    %c0_3 = arith.constant 0 : index
    %c0_4 = arith.constant 0 : index
    %2 = vector.load %arg4[%c0_3, %c0_4] : memref<4x32xf32, #tpu.memory_space<vmem>>, vector<4x32xf32>
    %c0_5 = arith.constant 0 : index
    %c0_6 = arith.constant 0 : index
    %3 = vector.load %arg5[%c0_5, %c0_6] : memref<4x1xf32, #tpu.memory_space<vmem>>, vector<4x1xf32>
    %c0_i32 = arith.constant 0 : i32
    %4 = tpu.assume_multiple %c0_i32, 128 : i32
    %5 = arith.index_cast %4 : i32 to index
    %c0_7 = arith.constant 0 : index
    %6 = vector.load %arg1[%5, %c0_7] : memref<128x8xf32, #tpu.memory_space<vmem>>, vector<128x8xf32>
    %7 = tpu.transpose %6, [1, 0] : vector<128x8xf32> -> vector<8x128xf32>
    %cst = arith.constant dense<0.000000e+00> : vector<32x128xf32>
    %8 = tpu.matmul %0, %7, %cst {dimension_numbers = #tpu.dot_dimension_numbers<[1], [0], [0], [1], [0, 0, 1, 1], [], []>} : vector<32x8xf32>, vector<8x128xf32>, vector<32x128xf32> -> vector<32x128xf32>
    %9 = vector.broadcast %1 : vector<32x1xf32> to vector<32x128xf32>
    %10 = arith.addf %8, %9 : vector<32x128xf32>
    %cst_8 = arith.constant 0.000000e+00 : f32
    %11 = vector.broadcast %cst_8 : f32 to vector<32x128xf32>
    %12 = arith.maximumf %10, %11 : vector<32x128xf32>
    %cst_9 = arith.constant dense<0.000000e+00> : vector<4x128xf32>
    %13 = tpu.matmul %2, %12, %cst_9 {dimension_numbers = #tpu.dot_dimension_numbers<[1], [0], [0], [1], [0, 0, 1, 1], [], []>} : vector<4x32xf32>, vector<32x128xf32>, vector<4x128xf32> -> vector<4x128xf32>
    %14 = vector.broadcast %3 : vector<4x1xf32> to vector<4x128xf32>
    %15 = arith.addf %13, %14 : vector<4x128xf32>
    %cst_10 = arith.constant dense<0xFF800000> : vector<128xf32>
    %16 = vector.multi_reduction <maximumf>, %15, %cst_10 [0] : vector<4x128xf32> to vector<128xf32>
    %17 = vector.shape_cast %16 : vector<128xf32> to vector<1x128xf32>
    %18 = vector.broadcast %17 : vector<1x128xf32> to vector<4x128xf32>
    %19 = arith.subf %15, %18 : vector<4x128xf32>
    %20 = math.exp %19 : vector<4x128xf32>
    %cst_11 = arith.constant dense<0.000000e+00> : vector<128xf32>
    %21 = vector.multi_reduction <add>, %20, %cst_11 [0] : vector<4x128xf32> to vector<128xf32>
    %22 = vector.shape_cast %21 : vector<128xf32> to vector<1x128xf32>
    %23 = vector.broadcast %22 : vector<1x128xf32> to vector<4x128xf32>
    %24 = arith.divf %20, %23 : vector<4x128xf32>
    %c0_12 = arith.constant 0 : index
    %25 = arith.index_cast %4 : i32 to index
    %26 = vector.load %arg6[%c0_12, %25] : memref<4x128xf32, #tpu.memory_space<vmem>>, vector<4x128xf32>
    tpu.vector_store %arg6[%c0_12, %25], %24 {strides = array<i32>} : memref<4x128xf32, #tpu.memory_space<vmem>>, vector<4x128xf32>,
    return
  }
  func.func @transform_0(%arg0: i32) -> (i32, i32) {
    %c0_i32 = arith.constant 0 : i32
    %c0_i32_0 = arith.constant 0 : i32
    return %arg0, %c0_i32 : i32, i32
  }
  func.func @transform_1(%arg0: i32) -> (i32, i32) {
    %c0_i32 = arith.constant 0 : i32
    %c0_i32_0 = arith.constant 0 : i32
    %c0_i32_1 = arith.constant 0 : i32
    return %c0_i32, %c0_i32_0 : i32, i32
  }
  func.func @transform_2(%arg0: i32) -> (i32, i32) {
    %c0_i32 = arith.constant 0 : i32
    %c0_i32_0 = arith.constant 0 : i32
    %c0_i32_1 = arith.constant 0 : i32
    return %c0_i32, %c0_i32_0 : i32, i32
  }
  func.func @transform_3(%arg0: i32) -> (i32, i32) {
    %c0_i32 = arith.constant 0 : i32
    %c0_i32_0 = arith.constant 0 : i32
    %c0_i32_1 = arith.constant 0 : i32
    return %c0_i32, %c0_i32_0 : i32, i32
  }
  func.func @transform_4(%arg0: i32) -> (i32, i32) {
    %c0_i32 = arith.constant 0 : i32
    %c0_i32_0 = arith.constant 0 : i32
    %c0_i32_1 = arith.constant 0 : i32
    return %c0_i32, %c0_i32_0 : i32, i32
  }
  func.func @transform_5(%arg0: i32) -> (i32, i32) {
    %c0_i32 = arith.constant 0 : i32
    %c0_i32_0 = arith.constant 0 : i32
    return %c0_i32, %arg0 : i32, i32
  }
}

</mosaic_0001>

<bundles_post_ra>
// kernel: tpu_custom_call.1
= control target key start
LH: loop header
LB: loop body
LE: loop exit
PB: predicated region body
PF: predicated region fallthrough
CT: control target
= control target key end

     0   :  { %vm67_vm0 = vcmask 64512   ;;  %v458_v2 = vmov 0   ;;  %s609_s0 = inlined_call_operand.vmem [shape: f32[128,8], index: 0, kind: input, shape index: {}]   ;;  %s610_s1 = inlined_call_operand.vmem [shape: f32[32,8], index: 1, kind: input, shape index: {}]   ;;  %s611_s2 = inlined_call_operand.vmem [shape: f32[32,1], index: 2, kind: input, shape index: {}]   ;;  %s612_s3 = inlined_call_operand.vmem [shape: f32[4,32], index: 3, kind: input, shape index: {}]   ;;  %s613_s4 = inlined_call_operand.vmem [shape: f32[4,1], index: 4, kind: input, shape index: {}]   ;;  %s614_s5 = inlined_call_operand.hbm [shape: f32[4,128], index: 5, kind: output, shape index: {}]  }
   0x1   :  { %v46_v0 = vld [vmem:[%s609_s0 + $0x78] sm:$0xff]  ;;  %v45_v1 = vld [vmem:[%s609_s0 + $0x70] sm:$0xff]  ;;  %430 = vset.pattern.permute.xlu0 %v458_v2  ;;  %431 = vset.pattern.permute.xlu1 %v458_v2  ;;  %v44_v3 = vld [vmem:[%s609_s0 + $0x68] sm:$0xff] }
   0x2   :  { %377 = vmatprep.subr.msk.mxu0 %vm67_vm0, %v46_v0  ;;  %v21_v4 = vld [vmem:[%s610_s1] sm:$0xff]  ;;  %v28_v5 = vld [vmem:[%s611_s2 + $0x18] sm:$0xff]  ;;  %v26_v6 = vld [vmem:[%s611_s2 + $0x8] sm:$0xff] }
   0x3   :  { %378 = vmatpush3.xpose.msk.msra.mxu0 %vm67_vm0, %v46_v0  ;;  %409 = vmatprep.mubr.msk.f32.mxu0 %vm67_vm0, %v21_v4  ;;  %v43_v7 = vld [vmem:[%s609_s0 + $0x60] sm:$0xff]  ;;  %v27_v8 = vld [vmem:[%s611_s2 + $0x10] sm:$0xff] }
   0x4   :  { %379 = vmatprep.subr.msk.mxu0 %vm67_vm0, %v45_v1  ;;  %64 = vperm.xlu0 %430, %v28_v5  }
   0x5   :  { %54 = vperm.xlu1 %431, %v26_v6  }
   0x7   :  { %380 = vmatpush3.xpose.msk.msra.mxu0 %vm67_vm0, %v45_v1 }
   0x8   :  { %381 = vmatprep.subr.msk.mxu0 %vm67_vm0, %v44_v3 }
   0x9   :  { %10 = vsyncpa [#allocation3], 0  ;;  %v25_v9 = vld [vmem:[%s611_s2] sm:$0xff]  ;;  %59 = vperm.xlu0 %430, %v27_v8   ;;  %v42_v10 = vld [vmem:[%s609_s0 + $0x58] sm:$0xff]  ;;  %v459_v26 = vmov 0.0   ;;  %vm460_vm1 = vmmov 0  }
   0xa   :  { %v30_v11 = vld [vmem:[%s613_s4] sm:$0xf]  ;;  %49 = vperm.xlu1 %431, %v25_v9   ;;  %v41_v12 = vld [vmem:[%s609_s0 + $0x50] sm:$0xff]  ;;  %v40_v13 = vld [vmem:[%s609_s0 + $0x48] sm:$0xff]  ;;  %415 = vmatprep.subr.mxu1 %v459_v26  ;;  %vm222_vm2 = vcmask 261120   ;;  %vm296_vm3 = vcmask 1043456  }
   0xb   :  { %382 = vmatpush3.xpose.msk.msra.mxu0 %vm67_vm0, %v44_v3  ;;  %v39_v14 = vld [vmem:[%s609_s0 + $0x40] sm:$0xff]  ;;  %v38_v15 = vld [vmem:[%s609_s0 + $0x38] sm:$0xff]  ;;  %v37_v16 = vld [vmem:[%s609_s0 + $0x30] sm:$0xff]  ;;  %423 = vmatprep.mubr.msk.f32.mxu1 %vm460_vm1, %v459_v26 }
   0xc   :  { %383 = vmatprep.subr.msk.mxu0 %vm67_vm0, %v43_v7  ;;  %v36_v17 = vld [vmem:[%s609_s0 + $0x28] sm:$0xff]  ;;  %v35_v18 = vld [vmem:[%s609_s0 + $0x20] sm:$0xff]  ;;  %v34_v19 = vld [vmem:[%s609_s0 + $0x18] sm:$0xff] }
   0xd   :  { %219 = vperm.xlu0 %430, %v30_v11   ;;  %v33_v20 = vld [vmem:[%s609_s0 + $0x10] sm:$0xff]  ;;  %v32_v21 = vld [vmem:[%s609_s0 + $0x8] sm:$0xff]  ;;  %v31_v22 = vld [vmem:[%s609_s0] sm:$0xff] }
   0xe   :  { %v22_v23 = vld [vmem:[%s610_s1 + $0x8] sm:$0xff]  ;;  %v23_v24 = vld [vmem:[%s610_s1 + $0x10] sm:$0xff]  ;;  %v24_v25 = vld [vmem:[%s610_s1 + $0x18] sm:$0xff] }
   0xf   :  { %384 = vmatpush3.xpose.msk.msra.mxu0 %vm67_vm0, %v43_v7  ;;  %v29_v43 = vld [vmem:[%s612_s3] sm:$0xf]  ;;  %s461_s3 = smov [#allocation2]  }
  0x10   :  { %385 = vmatprep.subr.msk.mxu0 %vm67_vm0, %v42_v10  ;;  %s323_s15 = sshll.u32 %s461_s3, 4  ;;  %s324_s15 = int_to_ptr.vmem [resolvable:$true] %s323_s15 }
  0x11   :  { %s436_s16 = scalar_lea.vmem %s324_s15, 64  ;;  %p441_p1 = scmp.lt.s32.totalorder %s324_s15, %s324_s15 }
  0x12   :  { %p437_p0 = scmp.ne.s32.totalorder %s324_s15, %s436_s16  ;;  %p442_p2 = scmp.lt.s32.totalorder %s436_s16, %s436_s16 }
  0x13   :  { %386 = vmatpush3.xpose.msk.msra.mxu0 %vm67_vm0, %v42_v10 }
  0x14   :  { %387 = vmatprep.subr.msk.mxu0 %vm67_vm0, %v41_v12  ;;  %p443_p3 = por %p442_p2, %p441_p1 }
  0x16   :  { %p444_p4 = pnand %p443_p3, %p437_p0 }
  0x17   :  { %388 = vmatpush3.xpose.msk.msra.mxu0 %vm67_vm0, %v41_v12 }
  0x18   :  { %389 = vmatprep.subr.msk.mxu0 %vm67_vm0, %v40_v13 }
  0x1b   :  { %390 = vmatpush3.xpose.msk.msra.mxu0 %vm67_vm0, %v40_v13 }
  0x1c   :  { %391 = vmatprep.subr.msk.mxu0 %vm67_vm0, %v39_v14 }
  0x1f   :  { %392 = vmatpush3.xpose.msk.msra.mxu0 %vm67_vm0, %v39_v14 }
  0x20   :  { %393 = vmatprep.subr.msk.mxu0 %vm67_vm0, %v38_v15 }
  0x23   :  { %394 = vmatpush3.xpose.msk.msra.mxu0 %vm67_vm0, %v38_v15 }
  0x24   :  { %395 = vmatprep.subr.msk.mxu0 %vm67_vm0, %v37_v16 }
  0x27   :  { %396 = vmatpush3.xpose.msk.msra.mxu0 %vm67_vm0, %v37_v16 }
  0x28   :  { %397 = vmatprep.subr.msk.mxu0 %vm67_vm0, %v36_v17 }
  0x2b   :  { %398 = vmatpush3.xpose.msk.msra.mxu0 %vm67_vm0, %v36_v17 }
  0x2c   :  { %399 = vmatprep.subr.msk.mxu0 %vm67_vm0, %v35_v18 }
  0x2f   :  { %400 = vmatpush3.xpose.msk.msra.mxu0 %vm67_vm0, %v35_v18 }
  0x30   :  { %401 = vmatprep.subr.msk.mxu0 %vm67_vm0, %v34_v19 }
  0x33   :  { %402 = vmatpush3.xpose.msk.msra.mxu0 %vm67_vm0, %v34_v19 }
  0x34   :  { %403 = vmatprep.subr.msk.mxu0 %vm67_vm0, %v33_v20 }
  0x37   :  { %404 = vmatpush3.xpose.msk.msra.mxu0 %vm67_vm0, %v33_v20 }
  0x38   :  { %405 = vmatprep.subr.msk.mxu0 %vm67_vm0, %v32_v21 }
  0x3b   :  { %406 = vmatpush3.xpose.msk.msra.mxu0 %vm67_vm0, %v32_v21 }
  0x3c   :  { %407 = vmatprep.subr.msk.mxu0 %vm67_vm0, %v31_v22 }
  0x3f   :  { %408 = vmatpush3.xpose.msk.msra.mxu0 %vm67_vm0, %v31_v22 }
  0x42   :  { %410 = vmatmul.mubr.msk.f32.vlgmr.msra.gmra.mxu0 %vm67_vm0, %v22_v23 }
  0x43   :  { %412 = vmatprep.mubr.msk.f32.mxu0 %vm67_vm0, %v23_v24 }
  0x46   :  { %413 = vmatmul.mubr.msk.f32.gmra.mxu0 %vm67_vm0, %v24_v25 }
  0x7f   :  { %v65_v27 = vpop.permute.xlu0 %64 }
  0x80   :  { %v55_v28 = vpop.permute.xlu1 %54 }
  0x84   :  { %v60_v32 = vpop.permute.xlu0 %59 }
  0x85   :  { %v50_v34 = vpop.permute.xlu1 %49 }
  0x88   :  { %v220_v44 = vpop.permute.xlu0 %219 }
 0x102   :  { %v411_v29 = vpop.f32.mrf.mxu0 }
 0x103   :  { %v200_v36 = vadd.f32 %v411_v29, %v55_v28 }
 0x104   :  { %v194_v30 = vpop.f32.mrf.mxu0 }
 0x105   :  { %v195_v39 = vadd.f32 %v194_v30, %v50_v34  ;;  %v214_v41 = vmax.f32 %v200_v36, 0.0 }
 0x106   :  { %v414_v31 = vpop.f32.mrf.mxu0 }
 0x107   :  { %v210_v33 = vadd.f32 %v414_v31, %v65_v27  ;;  %v213_v42 = vmax.f32 %v195_v39, 0.0 }
 0x108   :  { %v204_v35 = vpop.f32.mrf.mxu0 }
 0x109   :  { %v216_v37 = vmax.f32 %v210_v33, 0.0  ;;  %v205_v38 = vadd.f32 %v204_v35, %v60_v32 }
 0x10b   :  { %v215_v40 = vmax.f32 %v205_v38, 0.0  ;;  %416 = vmatpush3.msra.mxu1 %v216_v37 }
 0x10c   :  { %417 = vmatprep.subr.mxu1 %v459_v26 }
 0x10d   :  { %418 = vmatpush3.msra.mxu1 %v215_v40 }
 0x10e   :  { %419 = vmatprep.subr.mxu1 %v459_v26 }
 0x10f   :  { %420 = vmatpush3.msra.mxu1 %v214_v41 }
 0x110   :  { %421 = vmatprep.subr.mxu1 %v459_v26 }
 0x111   :  { %422 = vmatpush3.msra.mxu1 %v213_v42 }
 0x112   :  { %424 = vmatmul.mubr.msk.f32.vlgmr.msra.gmra.mxu1 %vm222_vm2, %v29_v43 }
 0x1d2   :  { %v292_v45 = vpop.f32.mrf.mxu1 }
 0x1d3   :  { %v293_v46 = vadd.f32 %v292_v45, %v220_v44 }
 0x1d4   :  { %v425_v47 = vpop.f32.mrf.mxu1 }
 0x1d5   :  { %v297_v48 = vsel %vm296_vm3, %v293_v46, -inf }
 0x1d6   :  { %v298_v49 = vrot.slane %v297_v48, 4 }
 0x1d8   :  { %v299_v50 = vmax.f32 %v297_v48, %v298_v49 }
 0x1da   :  { %v300_v51 = vrot.slane %v299_v50, 2 }
 0x1dc   :  { %v301_v52 = vmax.f32 %v299_v50, %v300_v51 }
 0x1de   :  { %v302_v53 = vrot.slane %v301_v52, 1 }
 0x1e0   :  { %v303_v54 = vmax.f32 %v301_v52, %v302_v53 }
 0x1e2   :  { %v304_v55 = vsub.f32 %v293_v46, %v303_v54 }
 0x1e4   :  { %v305_v56 = vmul.f32 1.442695, %v304_v55 }
 0x1e6   :  { %432 = vpow2.f32 %v305_v56 }
 0x1f3   :  { %v433_v57 = vpop.eup %432 }
 0x1f4   :  { %v307_v58 = vsel %vm296_vm3, %v433_v57, 0.0 }
 0x1f5   :  { %v308_v59 = vrot.slane %v307_v58, 4 }
 0x1f7   :  { %v309_v60 = vadd.f32 %v308_v59, %v307_v58 }
 0x1f9   :  { %v310_v61 = vrot.slane %v309_v60, 2 }
 0x1fb   :  { %v311_v62 = vadd.f32 %v310_v61, %v309_v60 }
 0x1fd   :  { %v312_v63 = vrot.slane %v311_v62, 1 }
 0x1ff   :  { %v313_v0 = vadd.f32 %v312_v63, %v311_v62 }
 0x201   :  { %434 = vrcp.f32 %v313_v0 }
 0x20e   :  { %v435_v1 = vpop.eup %434 }
 0x20f   :  { %v315_v2 = vmul.f32 %v435_v1, %v433_v57 }
 0x211   :  { %316 = vst [vmem:[#allocation2] sm:$0xf] %v315_v2 }
 0x212   :  { %447 = shalt.err (!%p444_p4)
}
 0x213   :  { %326 = dma.vmem_to_hbm [thread:$0]  %s324_s15, 64, %s614_s5, [#allocation3]  }
 0x214   :  { %456 = dma.done.wait [#allocation3], 64  }
 0x215   :  { %457 = vsyncadd [#allocation3], 4294967232 }
 0x216   :  { %330 = vsyncpa [#allocation3], 1 }

</bundles_post_ra>
